<compile_context>
chip_gen: v7x
topology: tpu7x:2x2x1
jax: 0.10.0
libtpu: 0.0.40
codegen_flags: <defaults>
</compile_context>

<pallas_src>
import jax
import jax.numpy as jnp
from jax.experimental import pallas as pl
from jax.experimental.pallas import tpu as pltpu

LANE = 128        # class axis padded to lane width -> unmasked vst stores
ROW_TILE = 16     # batch-row quantum: covers f32 (8,128) and bf16 (16,128) tiles
NEG_INF = -1e30   # finite "-inf" so padded classes get prob 0, never NaN


def _round_up(n, m):
    return ((n + m - 1) // m) * m


def prepare_params(weight, bias, *, mxu_dtype=jnp.bfloat16):
    """One-time parameter prep (hoisted out of the per-call hot path).

    weight: (D_out, D_in) -> w_t_pad: (D_in, D_out_pad), padded cols = 0, mxu_dtype
    bias:   (D_out,)      -> b_pad:   (1, D_out_pad),    padded cols = NEG_INF, f32
    """
    d_out, d_in = weight.shape
    d_out_pad = _round_up(d_out, LANE)
    w_t_pad = jnp.zeros((d_in, d_out_pad), mxu_dtype).at[:, :d_out].set(
        weight.astype(mxu_dtype).T
    )
    b_pad = jnp.full((1, d_out_pad), NEG_INF, jnp.float32).at[0, :d_out].set(
        bias.astype(jnp.float32)
    )
    return w_t_pad, b_pad


def categorical_kernel(x_ref, w_ref, b_ref, logp_ref, probs_ref):
    # MXU: (TB, D_in) @ (D_in, D_out_pad), bf16 inputs, f32 accumulate; + bias.
    logits = (
        jnp.dot(x_ref[...], w_ref[...], preferred_element_type=jnp.float32)
        + b_ref[...]
    )
    # Stable logsumexp / softmax over the lane-dense padded class axis (f32).
    m = jnp.max(logits, axis=-1, keepdims=True)
    shifted = logits - m                       # padded cols ~ -1e30
    e = jnp.exp(shifted)                       # EUP; padded cols -> 0
    s = jnp.sum(e, axis=-1, keepdims=True)
    logp_ref[...] = shifted - jnp.log(s)       # = logits - logsumexp(logits)
    # probs = e / s via one (TB,1) reciprocal + a VALU multiply (no second
    # full-tile EUP exp); stored bf16 to halve its HBM write traffic.
    inv_s = pl.reciprocal(s, approx=False)
    probs_ref[...] = (e * inv_s).astype(probs_ref.dtype)


def categorical_forward(x, w_t_pad, b_pad, d_out, *, tile_b=1024):
    """x: (B, D_in); w_t_pad/b_pad from prepare_params.

    Returns (log_probs f32, probs bf16), each (B, d_out) — the normalized
    log-probs and probabilities FixedCategorical(logits=x@W^T+b) would hold.
    """
    B, d_in = x.shape
    d_out_pad = w_t_pad.shape[1]

    # Feed the MXU in the prepared (bf16) dtype; softmax math stays f32.
    x = x.astype(w_t_pad.dtype)

    # Batch tiling: big tiles (default 1024) amortize the ~0.35us/step overhead;
    # clamp so the grid has >=2 steps whenever the batch is large enough to
    # split without pure-padding tiles (v7x: both TensorCores get work).
    b_sub = _round_up(B, ROW_TILE)
    tb = min(_round_up(tile_b, ROW_TILE), b_sub)
    if tb == b_sub and b_sub >= 2 * ROW_TILE:
        tb = _round_up(b_sub // 2, ROW_TILE)
    b_rows = _round_up(B, tb)
    if b_rows != B:
        x = jnp.pad(x, ((0, b_rows - B), (0, 0)))
    grid = (b_rows // tb,)

    in_bytes = (
        x.size * x.dtype.itemsize
        + w_t_pad.size * w_t_pad.dtype.itemsize
        + b_pad.size * b_pad.dtype.itemsize
    )
    out_bytes = b_rows * d_out_pad * (4 + 2)   # f32 log_probs + bf16 probs
    cost = pl.CostEstimate(
        flops=2 * b_rows * d_in * d_out_pad + 5 * b_rows * d_out_pad,
        transcendentals=b_rows * (d_out_pad + 2),     # exp + log + recip
        bytes_accessed=in_bytes + out_bytes,
    )

    logp, probs = pl.pallas_call(
        categorical_kernel,
        out_shape=(
            jax.ShapeDtypeStruct((b_rows, d_out_pad), jnp.float32),   # log_probs
            jax.ShapeDtypeStruct((b_rows, d_out_pad), jnp.bfloat16),  # probs
        ),
        grid_spec=pltpu.PrefetchScalarGridSpec(
            num_scalar_prefetch=0,
            grid=grid,
            in_specs=[
                # x batch tile: double-buffered by the pipeline.
                pl.BlockSpec((tb, d_in), lambda i: (i, 0)),
                # Grid-invariant weight/bias: single-buffered (no point holding
                # two copies of a block whose index never changes).
                pl.BlockSpec((d_in, d_out_pad), lambda i: (0, 0),
                             pipeline_mode=pl.Buffered(1)),
                pl.BlockSpec((1, d_out_pad), lambda i: (0, 0),
                             pipeline_mode=pl.Buffered(1)),
            ],
            out_specs=[
                pl.BlockSpec((tb, d_out_pad), lambda i: (i, 0)),
                pl.BlockSpec((tb, d_out_pad), lambda i: (i, 0)),
            ],
        ),
        compiler_params=pltpu.CompilerParams(
            # Independent batch tiles -> shard across TCs (v7x megacore).
            dimension_semantics=("parallel",),
            # Headroom for big tiles / large d_in (v5e default scoped is 16 MiB).
            vmem_limit_bytes=48 * 1024 * 1024,
        ),
        cost_estimate=cost,
    )(x, w_t_pad, b_pad)

    # Slice away batch / class padding (padded classes carry prob 0).
    return logp[:B, :d_out], probs[:B, :d_out]


if __name__ == "__main__":
    # Sizes implied by Categorical(num_inputs, num_outputs).
    batch = 2
    num_inputs = 32
    num_outputs = 8
    init_w = 0.5

    key = jax.random.PRNGKey(0)
    kx, kw, kb = jax.random.split(key, 3)

    # Deterministic parameter init matching .uniform_(-0.5, 0.5).
    weight = jax.random.uniform(
        kw, (num_outputs, num_inputs), jnp.float32, minval=-init_w, maxval=init_w
    )
    bias = jax.random.uniform(
        kb, (num_outputs,), jnp.float32, minval=-init_w, maxval=init_w
    )
    x = jax.random.normal(kx, (batch, num_inputs), jnp.float32)

    # One-time param prep (transpose + lane padding + bf16 cast hoisted).
    w_t_pad, b_pad = prepare_params(weight, bias)

    log_probs, probs = categorical_forward(x, w_t_pad, b_pad, num_outputs)
    jax.block_until_ready((log_probs, probs))

    # Reference 1: matched precision (same bf16 inputs the kernel feeds the MXU).
    xw = jnp.dot(
        x.astype(jnp.bfloat16), w_t_pad[:, :num_outputs],
        preferred_element_type=jnp.float32,
    )
    ref_logits = xw + bias
    ref_logp = ref_logits - jax.nn.logsumexp(ref_logits, axis=-1, keepdims=True)
    ref_probs = jax.nn.softmax(ref_logits, axis=-1)
    assert jnp.allclose(log_probs, ref_logp, atol=1e-5)
    assert jnp.allclose(
        probs.astype(jnp.float32), ref_probs, atol=5e-3   # bf16 probs rounding
    )

    # Reference 2: pure-f32 torch semantics (bf16 MXU feed costs a few 1e-3).
    f32_logits = x @ weight.T + bias
    f32_logp = f32_logits - jax.nn.logsumexp(f32_logits, axis=-1, keepdims=True)
    assert jnp.allclose(log_probs, f32_logp, atol=2e-2)

    # FixedCategorical.mode() == argmax(probs, -1, keepdims=True); argmax(probs)
    # == argmax(log_probs), checked on the f32 tensor to avoid bf16 tie noise.
    assert jnp.array_equal(
        jnp.argmax(log_probs, axis=-1), jnp.argmax(ref_logp, axis=-1)
    )
    # TODO(synk): FixedCategorical.sample() (stochastic draw) is outside the
    # deterministic forward pass and is left to the caller (e.g. jax.random).

    print("KERNEL_OK")
</pallas_src>

<mosaic_0001>
module attributes {stable_mosaic.version = 11 : i64} {
  func.func @categorical_kernel(%arg0: i32, %arg1: memref<16x32xbf16, #tpu.memory_space<vmem>>, %arg2: memref<32x128xbf16, #tpu.memory_space<vmem>>, %arg3: memref<1x128xf32, #tpu.memory_space<vmem>>, %arg4: memref<16x128xf32, #tpu.memory_space<vmem>>, %arg5: memref<16x128xbf16, #tpu.memory_space<vmem>>) attributes {dimension_semantics = [#tpu.dimension_semantics<parallel>], iteration_bounds = array<i64: 1>, scalar_prefetch = 0 : i64, scratch_operands = 0 : i64, tpu.core_type = #tpu.core_type<tc>, window_params = [{transform_indices = @transform_0, window_bounds = array<i64: 16, 32>}, {pipeline_mode = #tpu.pipeline_mode<synchronous>, transform_indices = @transform_1, window_bounds = array<i64: 32, 128>}, {pipeline_mode = #tpu.pipeline_mode<synchronous>, transform_indices = @transform_2, window_bounds = array<i64: 1, 128>}, {transform_indices = @transform_3, window_bounds = array<i64: 16, 128>}, {transform_indices = @transform_4, window_bounds = array<i64: 16, 128>}]} {
    %c0 = arith.constant 0 : index
    %c0_0 = arith.constant 0 : index
    %0 = vector.load %arg1[%c0, %c0_0] : memref<16x32xbf16, #tpu.memory_space<vmem>>, vector<16x32xbf16>
    %c0_1 = arith.constant 0 : index
    %c0_2 = arith.constant 0 : index
    %1 = vector.load %arg2[%c0_1, %c0_2] : memref<32x128xbf16, #tpu.memory_space<vmem>>, vector<32x128xbf16>
    %cst = arith.constant dense<0.000000e+00> : vector<16x128xf32>
    %2 = tpu.matmul %0, %1, %cst {dimension_numbers = #tpu.dot_dimension_numbers<[1], [0], [0], [1], [0, 0, 1, 1], [], []>} : vector<16x32xbf16>, vector<32x128xbf16>, vector<16x128xf32> -> vector<16x128xf32>
    %c0_3 = arith.constant 0 : index
    %c0_4 = arith.constant 0 : index
    %3 = vector.load %arg3[%c0_3, %c0_4] : memref<1x128xf32, #tpu.memory_space<vmem>>, vector<1x128xf32>
    %4 = vector.broadcast %3 : vector<1x128xf32> to vector<16x128xf32>
    %5 = arith.addf %2, %4 : vector<16x128xf32>
    %cst_5 = arith.constant dense<0xFF800000> : vector<16xf32>
    %6 = vector.multi_reduction <maximumf>, %5, %cst_5 [1] : vector<16x128xf32> to vector<16xf32>
    %7 = vector.shape_cast %6 : vector<16xf32> to vector<16x1xf32>
    %8 = vector.broadcast %7 : vector<16x1xf32> to vector<16x128xf32>
    %9 = arith.subf %5, %8 : vector<16x128xf32>
    %10 = math.exp %9 : vector<16x128xf32>
    %cst_6 = arith.constant dense<0.000000e+00> : vector<16xf32>
    %11 = vector.multi_reduction <add>, %10, %cst_6 [1] : vector<16x128xf32> to vector<16xf32>
    %12 = vector.shape_cast %11 : vector<16xf32> to vector<16x1xf32>
    %13 = math.log %12 : vector<16x1xf32>
    %14 = vector.broadcast %13 : vector<16x1xf32> to vector<16x128xf32>
    %15 = arith.subf %9, %14 : vector<16x128xf32>
    %c0_7 = arith.constant 0 : index
    %c0_8 = arith.constant 0 : index
    %16 = vector.load %arg4[%c0_7, %c0_8] : memref<16x128xf32, #tpu.memory_space<vmem>>, vector<16x128xf32>
    tpu.vector_store %arg4[%c0_7, %c0_8], %15 {strides = array<i32>} : memref<16x128xf32, #tpu.memory_space<vmem>>, vector<16x128xf32>,
    %17 = tpu.reciprocal %12 : vector<16x1xf32> -> vector<16x1xf32>
    %18 = vector.broadcast %17 : vector<16x1xf32> to vector<16x128xf32>
    %19 = arith.mulf %10, %18 : vector<16x128xf32>
    %20 = arith.truncf %19 : vector<16x128xf32> to vector<16x128xbf16>
    %c0_9 = arith.constant 0 : index
    %c0_10 = arith.constant 0 : index
    %21 = vector.load %arg5[%c0_9, %c0_10] : memref<16x128xbf16, #tpu.memory_space<vmem>>, vector<16x128xbf16>
    tpu.vector_store %arg5[%c0_9, %c0_10], %20 {strides = array<i32>} : memref<16x128xbf16, #tpu.memory_space<vmem>>, vector<16x128xbf16>,
    return
  }
  func.func @transform_0(%arg0: i32) -> (i32, i32) {
    %c0_i32 = arith.constant 0 : i32
    %c0_i32_0 = arith.constant 0 : i32
    return %arg0, %c0_i32 : i32, i32
  }
  func.func @transform_1(%arg0: i32) -> (i32, i32) {
    %c0_i32 = arith.constant 0 : i32
    %c0_i32_0 = arith.constant 0 : i32
    %c0_i32_1 = arith.constant 0 : i32
    return %c0_i32, %c0_i32_0 : i32, i32
  }
  func.func @transform_2(%arg0: i32) -> (i32, i32) {
    %c0_i32 = arith.constant 0 : i32
    %c0_i32_0 = arith.constant 0 : i32
    %c0_i32_1 = arith.constant 0 : i32
    return %c0_i32, %c0_i32_0 : i32, i32
  }
  func.func @transform_3(%arg0: i32) -> (i32, i32) {
    %c0_i32 = arith.constant 0 : i32
    %c0_i32_0 = arith.constant 0 : i32
    return %arg0, %c0_i32 : i32, i32
  }
  func.func @transform_4(%arg0: i32) -> (i32, i32) {
    %c0_i32 = arith.constant 0 : i32
    %c0_i32_0 = arith.constant 0 : i32
    return %arg0, %c0_i32 : i32, i32
  }
}

</mosaic_0001>

<bundles_post_ra>
// kernel: tpu_custom_call.1
= control target key start
LH: loop header
LB: loop body
LE: loop exit
PB: predicated region body
PF: predicated region fallthrough
CT: control target
= control target key end

     0   :  { %10 = vsyncpa [#allocation3], 0  ;;  %s440_s0 = inlined_call_operand.hbm [shape: bf16[16,32], index: 0, kind: input, shape index: {}]   ;;  %s441_s1 = inlined_call_operand.hbm [shape: bf16[32,128], index: 1, kind: input, shape index: {}]   ;;  %s442_s2 = inlined_call_operand.vmem [shape: f32[1,128], index: 2, kind: input, shape index: {}]   ;;  %s443_s3 = inlined_call_operand.hbm [shape: f32[16,128], index: 3, kind: output, shape index: {0}]   ;;  %s444_s4 = inlined_call_operand.hbm [shape: bf16[16,128], index: 4, kind: output, shape index: {1}]  }
   0x1   :  { %11 = vsyncpa [#allocation6], 0 }
   0x2   :  { %12 = vsyncpa [#allocation4], 0 }
   0x3   :  { %13 = vsyncpa [#allocation9], 0  ;;  %s338_s15 = smov [#allocation2]   ;;  %s242_s19 = scalar_lea.hbm %s440_s0, 128 }
   0x4   :  { %s19_s16 = sshll.u32 %s338_s15, 4  ;;  %p243_p0 = scmp.ne.s32.totalorder %s440_s0, %s242_s19  ;;  %s20_s16 = int_to_ptr.vmem [resolvable:$true] %s19_s16 }
   0x5   :  { %p246_p1 = scmp.lt.u32.totalorder %s242_s19, %s440_s0 }
   0x7   :  { %p248_p2 = pnand %p246_p1, %p243_p0 }
   0x9   :  { %251 = shalt.err (!%p248_p2)
}
   0xa   :  { %s252_s24 = scalar_lea.vmem %s20_s16, 128  ;;  %p257_p4 = scmp.lt.s32.totalorder %s20_s16, %s20_s16 }
   0xb   :  { %p253_p3 = scmp.ne.s32.totalorder %s20_s16, %s252_s24  ;;  %p258_p5 = scmp.lt.s32.totalorder %s252_s24, %s252_s24 }
   0xd   :  { %p259_p6 = por %p258_p5, %p257_p4 }
   0xf   :  { %p260_p7 = pnand %p259_p6, %p253_p3 }
  0x11   :  { %263 = shalt.err (!%p260_p7)
}
  0x12   :  { %s339_s25 = smov 64   ;;  %s340_s26 = smov 4  }
  0x13   :  { %25 = dma.hbm_to_vmem [thread:$0]  %s440_s0, 128, %s20_s16, [#allocation3], %s339_s25, %s339_s25, %s340_s26  }
  0x14   :  { %s341_s29 = smov [#allocation5]   ;;  %s264_s7 = scalar_lea.hbm %s441_s1, 256 }
  0x15   :  { %s31_s30 = sshll.u32 %s341_s29, 4  ;;  %p265_p8 = scmp.ne.s32.totalorder %s441_s1, %s264_s7  ;;  %s32_s30 = int_to_ptr.vmem [resolvable:$true] %s31_s30 }
  0x16   :  { %p268_p9 = scmp.lt.u32.totalorder %s264_s7, %s441_s1 }
  0x18   :  { %p270_p10 = pnand %p268_p9, %p265_p8 }
  0x1a   :  { %273 = shalt.err (!%p270_p10)
}
  0x1b   :  { %s274_s12 = scalar_lea.vmem %s32_s30, 256  ;;  %p279_p12 = scmp.lt.s32.totalorder %s32_s30, %s32_s30 }
  0x1c   :  { %p275_p11 = scmp.ne.s32.totalorder %s32_s30, %s274_s12  ;;  %p280_p13 = scmp.lt.s32.totalorder %s274_s12, %s274_s12 }
  0x1e   :  { %p281_p0 = por %p280_p13, %p279_p12 }
  0x20   :  { %p282_p1 = pnand %p281_p0, %p275_p11 }
  0x22   :  { %285 = shalt.err (!%p282_p1)
}
  0x23   :  { %37 = dma.hbm_to_vmem [thread:$0]  %s441_s1, 256, %s32_s30, [#allocation6], %s339_s25, %s339_s25, %s340_s26  }
  0x24   :  { %330 = dma.done.wait [#allocation3], 128  }
  0x25   :  { %331 = vsyncadd [#allocation3], 4294967168 }
  0x26   :  { %332 = dma.done.wait [#allocation6], 256  }
  0x27   :  { %333 = vsyncadd [#allocation6], 4294967040  ;;  %v342_v0 = vmov 0.0   ;;  %vm343_vm0 = vmmov 0   ;;  %v227_v1 = vld [vmem:[#allocation5] sm:$0xff]   ;;  %v228_v2 = vld [vmem:[#allocation5 + $0x8] sm:$0xff]  }
  0x28   :  { %209 = vmatprep.subr.bf16.mxu0 %v342_v0  ;;  %213 = vmatprep.mubr.msk.bf16.mxu0 %vm343_vm0, %v342_v0  ;;  %v229_v3 = vld [vmem:[#allocation2] sm:$0xff]   ;;  %vm77_vm1 = vcmask 261120   ;;  %s344_s1 = smov [#allocation7]   ;;  %s345_s16 = smov [#allocation8]  }
  0x29   :  { %210 = vmatpush3.bf16.msra.mxu0 %v227_v1  ;;  %v192_v4 = vld [vmem:[%s442_s2] ss:$0 sm:$0xff]  ;;  %s163_s2 = sshll.u32 %s344_s1, 4  ;;  %s175_s17 = sshll.u32 %s345_s16, 4  ;;  %s164_s2 = int_to_ptr.vmem [resolvable:$true] %s163_s2  ;;  %s406_s17 = int_to_ptr.vmem [resolvable:$true] %s175_s17 }
  0x2a   :  { %211 = vmatprep.subr.bf16.mxu0 %v342_v0  ;;  %s286_s18 = scalar_lea.vmem %s164_s2, 256  ;;  %p291_p3 = scmp.lt.s32.totalorder %s164_s2, %s164_s2 }
  0x2b   :  { %p287_p2 = scmp.ne.s32.totalorder %s164_s2, %s286_s18  ;;  %p292_p4 = scmp.lt.s32.totalorder %s286_s18, %s286_s18 }
  0x2d   :  { %212 = vmatpush3.bf16.msra.mxu0 %v228_v2  ;;  %p293_p5 = por %p292_p4, %p291_p3 }
  0x2f   :  { %p294_p6 = pnand %p293_p5, %p287_p2 }
  0x30   :  { %214 = vmatmul.mubr.msk.bf16.vlgmr.msra.gmra.mrb[0].mxu0 %vm77_vm1, %v229_v3 }
 0x103   :  { %v115_v5 = vpop.f32.mrb[0].mxu0 }
 0x104   :  { %v116_v6 = vadd.f32 %v192_v4, %v115_v5  ;;  %v215_v7 = vpop.f32.mrb[1].mxu0 }
 0x105   :  { %v118_v8 = vpop.f32.mrb[2].mxu0 }
 0x106   :  { %122 = vmax.xlane.f32.xlu0 %v116_v6  ;;  %v216_v9 = vpop.f32.mrb[3].mxu0  ;;  %v119_v10 = vadd.f32 %v192_v4, %v118_v8 }
 0x10a   :  { %124 = vmax.xlane.f32.xlu0 %v119_v10 }
 0x193   :  { %v123_v11 = vpop.xlane.xlu0 %122 }
 0x194   :  { %v126_v12 = vsub.f32 %v116_v6, %v123_v11 }
 0x196   :  { %v128_v13 = vmul.f32 1.442695, %v126_v12 }
 0x197   :  { %v125_v14 = vpop.xlane.xlu0 %124 }
 0x198   :  { %230 = vpow2.f32 %v128_v13  ;;  %v127_v15 = vsub.f32 %v119_v10, %v125_v14 }
 0x19a   :  { %v130_v16 = vmul.f32 1.442695, %v127_v15 }
 0x19c   :  { %232 = vpow2.f32 %v130_v16 }
 0x1a2   :  { %v231_v17 = vpop.eup %230 }
 0x1a3   :  { %132 = vadd.xlane.f32.xlu1 %v231_v17 }
 0x1a6   :  { %v233_v18 = vpop.eup %232 }
 0x1a7   :  { %134 = vadd.xlane.f32.xlu1 %v233_v18 }
 0x230   :  { %v133_v19 = vpop.xlane.xlu1 %132 }
 0x231   :  { %234 = vlog2.f32 %v133_v19 }
 0x232   :  { %236 = vrcp.f32 %v133_v19 }
 0x234   :  { %v135_v20 = vpop.xlane.xlu1 %134 }
 0x235   :  { %238 = vlog2.f32 %v135_v20 }
 0x236   :  { %240 = vrcp.f32 %v135_v20 }
 0x23b   :  { %v235_v21 = vpop.eup %234 }
 0x23c   :  { %v137_v22 = vmul.f32 0.6931472, %v235_v21  ;;  %v237_v23 = vpop.eup %236 }
 0x23d   :  { %v146_v28 = vmul.f32 %v237_v23, %v231_v17 }
 0x23e   :  { %v140_v24 = vsub.f32 %v126_v12, %v137_v22 }
 0x23f   :  { %v239_v25 = vpop.eup %238 }
 0x240   :  { %v241_v26 = vpop.eup %240  ;;  %142 = vst [vmem:[#allocation7] sm:$0xff] %v140_v24  ;;  %v139_v27 = vmul.f32 0.6931472, %v239_v25 }
 0x241   :  { %v147_v29 = vmul.f32 %v241_v26, %v233_v18 }
 0x242   :  { %v141_v30 = vsub.f32 %v127_v15, %v139_v27 }
 0x243   :  { %v204_v31 = vpack.c.bf16 %v147_v29, %v146_v28 }
 0x244   :  { %143 = vst [vmem:[#allocation7 + $0x8] sm:$0xff] %v141_v30 }
 0x245   :  { %297 = shalt.err (!%p294_p6)
}
 0x246   :  { %s298_s21 = scalar_lea.hbm %s443_s3, 256 }
 0x247   :  { %p299_p7 = scmp.ne.s32.totalorder %s443_s3, %s298_s21  ;;  %p302_p8 = scmp.lt.u32.totalorder %s298_s21, %s443_s3 }
 0x249   :  { %p304_p9 = pnand %p302_p8, %p299_p7 }
 0x24b   :  { %307 = shalt.err (!%p304_p9)
}
 0x24c   :  { %s346_s28 = smov 128   ;;  %s347_s29 = smov 8   ;;  %205 = vst [vmem:[#allocation8] sm:$0xff] %v204_v31  }
 0x24d   :  { %169 = dma.vmem_to_hbm [thread:$0]  %s164_s2, 256, %s443_s3, [#allocation4], %s346_s28, %s346_s28, %s347_s29  }
 0x24e   :  { %s308_s6 = scalar_lea.vmem %s406_s17, 128  ;;  %p313_p11 = scmp.lt.s32.totalorder %s406_s17, %s406_s17 }
 0x24f   :  { %p309_p10 = scmp.ne.s32.totalorder %s406_s17, %s308_s6  ;;  %p314_p12 = scmp.lt.s32.totalorder %s308_s6, %s308_s6 }
 0x251   :  { %p315_p13 = por %p314_p12, %p313_p11 }
 0x253   :  { %p316_p0 = pnand %p315_p13, %p309_p10 }
 0x255   :  { %319 = shalt.err (!%p316_p0)
}
 0x256   :  { %s320_s9 = scalar_lea.hbm %s444_s4, 128 }
 0x257   :  { %p321_p1 = scmp.ne.s32.totalorder %s444_s4, %s320_s9  ;;  %p324_p2 = scmp.lt.u32.totalorder %s320_s9, %s444_s4 }
 0x259   :  { %p326_p3 = pnand %p324_p2, %p321_p1 }
 0x25b   :  { %329 = shalt.err (!%p326_p3)
}
 0x25c   :  { %181 = dma.vmem_to_hbm [thread:$0]  %s406_s17, 128, %s444_s4, [#allocation9], %s339_s25, %s339_s25, %s340_s26  }
 0x25d   :  { %334 = dma.done.wait [#allocation4], 256  }
 0x25e   :  { %335 = vsyncadd [#allocation4], 4294967040 }
 0x25f   :  { %336 = dma.done.wait [#allocation9], 128  }
 0x260   :  { %337 = vsyncadd [#allocation9], 4294967168 }
 0x261   :  { %188 = vsyncpa [#allocation3], 1 }
 0x262   :  { %189 = vsyncpa [#allocation6], 1 }
 0x263   :  { %190 = vsyncpa [#allocation4], 1 }
 0x264   :  { %191 = vsyncpa [#allocation9], 1 }

</bundles_post_ra>
